<compile_context>
chip_gen: v7x
topology: tpu7x:2x2x1
jax: 0.10.0
libtpu: 0.0.40
codegen_flags: <defaults>
</compile_context>

<pallas_src>
import functools

import jax
import jax.numpy as jnp
from jax.experimental import pallas as pl
from jax.experimental.pallas import tpu as pltpu


def _ccel_kernel(targets_ref, logits_ref, out_ref, m_acc, s_acc, t_acc, *,
                 alpha, n_classes):
    j = pl.program_id(1)  # class-tile index (innermost, "arbitrary")

    @pl.when(j == 0)
    def _init():
        m_acc[...] = jnp.full_like(m_acc, -jnp.inf)  # running row max
        s_acc[...] = jnp.zeros_like(s_acc)           # running sum of exp
        t_acc[...] = jnp.zeros_like(t_acc)           # target logit

    x = logits_ref[...]                    # (TN, TC) native dtype (bf16 ok)
    t = targets_ref[...]                   # (TN, 1) int32
    tn, tc = x.shape

    # Loop-invariant lane iota; global offsets handled by cheap scalar /
    # (TN,1) subtractions instead of a full-tile add.
    lane = jax.lax.broadcasted_iota(jnp.int32, (tn, tc), 1)

    # Mask the ragged last class tile BEFORE max/exp/gather.  Static no-op
    # when C is a multiple of TC (the common case), so it costs nothing then.
    if n_classes % tc != 0:
        valid = lane < (n_classes - j * tc)
        x = jnp.where(valid, x, jnp.asarray(-jnp.inf, dtype=x.dtype))

    # Row max and target gather on the native (bf16) tile: both exact
    # (max of already-bf16 values; at most one nonzero per row in the gather).
    tile_max = jnp.max(x, axis=-1, keepdims=True).astype(jnp.float32)
    is_tgt = lane == (t - j * tc)
    t_acc[...] += jnp.sum(jnp.where(is_tgt, x, jnp.zeros((), x.dtype)),
                          axis=-1, keepdims=True).astype(jnp.float32)

    # Online (flash-style) log-sum-exp over the class axis; f32 for accuracy.
    m_old = m_acc[...]
    m_new = jnp.maximum(m_old, tile_max)
    xf = x.astype(jnp.float32)
    s_acc[...] = s_acc[...] * jnp.exp(m_old - m_new) + jnp.sum(
        jnp.exp(xf - m_new), axis=-1, keepdims=True)
    m_acc[...] = m_new

    @pl.when(j == pl.num_programs(1) - 1)
    def _finalize():
        lse = m_acc[...] + jnp.log(s_acc[...])
        ce = lse - t_acc[...]
        confidence = jnp.exp(-ce)
        concave = -jnp.exp(confidence)
        out_ref[...] = (alpha * ce + (1.0 - alpha) * concave).astype(out_ref.dtype)


def _round_up(x, m):
    return (x + m - 1) // m * m


def _vmem_capacity_bytes(default=64 * 1024 * 1024):
    try:
        info = pltpu.get_tpu_info()
        return int(getattr(info, "vmem_capacity_bytes", default))
    except Exception:
        return default


def ccel(logits, targets, alpha=0.5, reduction='none', *,
         block_n=256, block_c=None):
    """Pallas CCEL. logits: (N, C) float (any float dtype); targets: (N,) ints."""
    if not jnp.issubdtype(logits.dtype, jnp.floating):
        logits = logits.astype(jnp.float32)
    N, C = logits.shape

    # Generation-aware tile / VMEM sizing (v5e/v6e: 128 MiB VMEM -> big tiles &
    # 64 MiB scoped limit; v7x: 64 MiB physical -> 4096-wide tiles, 32 MiB limit).
    vmem_cap = _vmem_capacity_bytes()
    if block_c is None:
        block_c = 8192 if vmem_cap >= 96 * 1024 * 1024 else 4096
    vmem_limit = min(64 * 1024 * 1024, max(vmem_cap // 2, 16 * 1024 * 1024))

    # Class tiling: one full-width tile for small C, otherwise 128-multiples;
    # the ragged last tile (if any) is masked inside the kernel -> no jnp.pad.
    TC = C if C <= block_c else block_c

    # Row tiling: multiples of 8 sublanes, no padding (OOB rows are garbage
    # that is sliced off / write-masked).  Keep >=2 row tiles when N allows so
    # v7x's two TensorCores both get work on the "parallel" axis.
    TN = min(block_n, _round_up(N, 8))
    if N > 8 and pl.cdiv(N, TN) < 2:
        TN = _round_up(pl.cdiv(N, 2), 8)

    grid = (pl.cdiv(N, TN), pl.cdiv(C, TC))

    targets_2d = targets.astype(jnp.int32).reshape(N, 1)

    out = pl.pallas_call(
        functools.partial(_ccel_kernel, alpha=float(alpha), n_classes=C),
        out_shape=jax.ShapeDtypeStruct((N, 1), jnp.float32),
        grid_spec=pltpu.PrefetchScalarGridSpec(
            num_scalar_prefetch=0,
            grid=grid,
            in_specs=[
                # targets: invariant in j -> kept resident by the pipeline.
                pl.BlockSpec((TN, 1), lambda i, j: (i, 0)),
                pl.BlockSpec((TN, TC), lambda i, j: (i, j)),   # logits stream
            ],
            out_specs=pl.BlockSpec((TN, 1), lambda i, j: (i, 0)),
            scratch_shapes=[
                pltpu.VMEM((TN, 1), jnp.float32),  # running max
                pltpu.VMEM((TN, 1), jnp.float32),  # running sum-exp
                pltpu.VMEM((TN, 1), jnp.float32),  # target logit
            ],
        ),
        compiler_params=pltpu.CompilerParams(
            dimension_semantics=("parallel", "arbitrary"),
            vmem_limit_bytes=vmem_limit,
        ),
    )(targets_2d, logits)

    loss = out[:, 0]
    if reduction == 'mean':
        return loss.mean()
    if reduction == 'sum':
        return loss.sum()
    return loss


def ccel_reference(logits, targets, alpha=0.5):
    # Plain-JAX reference of F.cross_entropy(reduction='none') + CCE transform.
    logp = jax.nn.log_softmax(logits.astype(jnp.float32), axis=-1)
    ce = -jnp.take_along_axis(logp, targets[:, None].astype(jnp.int32),
                              axis=-1)[:, 0]
    confidence = jnp.exp(-ce)
    concave = -jnp.exp(confidence)
    return alpha * ce + (1.0 - alpha) * concave


if __name__ == "__main__":
    key = jax.random.PRNGKey(0)
    k1, k2, k3, k4 = jax.random.split(key, 4)

    # Case 1: small, single tile in both dims, f32 input.
    N1, C1 = 8, 32
    logits1 = jax.random.normal(k1, (N1, C1), dtype=jnp.float32)
    targets1 = jax.random.randint(k2, (N1,), 0, C1, dtype=jnp.int32)
    loss1 = jax.block_until_ready(ccel(logits1, targets1, alpha=0.5))
    ref1 = ccel_reference(logits1, targets1, alpha=0.5)
    assert loss1.shape == (N1,)
    assert jnp.allclose(loss1, ref1, atol=1e-4, rtol=1e-5), (loss1, ref1)

    # Case 2: multiple row/class tiles, ragged N and C (in-kernel mask path),
    # bf16 input.
    N2, C2 = 50, 200
    logits2 = (4.0 * jax.random.normal(k3, (N2, C2), dtype=jnp.float32)
               ).astype(jnp.bfloat16)
    targets2 = jax.random.randint(k4, (N2,), 0, C2, dtype=jnp.int32)
    loss2 = jax.block_until_ready(
        ccel(logits2, targets2, alpha=0.25, block_n=16, block_c=128))
    ref2 = ccel_reference(logits2, targets2, alpha=0.25)
    assert loss2.shape == (N2,)
    assert jnp.allclose(loss2, ref2, atol=1e-4, rtol=1e-4), (loss2, ref2)

    # Case 3: same data, default (generation-aware) tiles -> single class tile,
    # auto-split row axis into >=2 ragged row tiles.
    loss3 = jax.block_until_ready(ccel(logits2, targets2, alpha=0.25))
    assert loss3.shape == (N2,)
    assert jnp.allclose(loss3, ref2, atol=1e-4, rtol=1e-4), (loss3, ref2)

    # Reductions share the same kernel.
    m = jax.block_until_ready(ccel(logits1, targets1, alpha=0.5, reduction='mean'))
    assert jnp.allclose(m, ref1.mean(), atol=1e-4, rtol=1e-5)
    s = jax.block_until_ready(ccel(logits1, targets1, alpha=0.5, reduction='sum'))
    assert jnp.allclose(s, ref1.sum(), atol=1e-4, rtol=1e-5)

    print("KERNEL_OK")
</pallas_src>

<mosaic_0001>
module attributes {stable_mosaic.version = 11 : i64} {
  func.func @_ccel_kernel(%arg0: i32, %arg1: i32, %arg2: memref<8x1xi32, #tpu.memory_space<vmem>>, %arg3: memref<8x32xf32, #tpu.memory_space<vmem>>, %arg4: memref<8x1xf32, #tpu.memory_space<vmem>>, %arg5: memref<8x1xf32, #tpu.memory_space<vmem>>, %arg6: memref<8x1xf32, #tpu.memory_space<vmem>>, %arg7: memref<8x1xf32, #tpu.memory_space<vmem>>) attributes {dimension_semantics = [#tpu.dimension_semantics<parallel>, #tpu.dimension_semantics<arbitrary>], iteration_bounds = array<i64: 1, 1>, scalar_prefetch = 0 : i64, scratch_operands = 3 : i64, tpu.core_type = #tpu.core_type<tc>, window_params = [{transform_indices = @transform_0, window_bounds = array<i64: 8, 1>}, {transform_indices = @transform_1, window_bounds = array<i64: 8, 32>}, {transform_indices = @transform_2, window_bounds = array<i64: 8, 1>}]} {
    %c0_i32 = arith.constant 0 : i32
    %0 = arith.cmpi eq, %arg1, %c0_i32 : i32
    %1 = arith.extui %0 : i1 to i32
    %c0_i32_0 = arith.constant 0 : i32
    %2 = arith.cmpi ne, %1, %c0_i32_0 : i32
    scf.if %2 {
      %cst_21 = arith.constant 0xFF800000 : f32
      %37 = vector.broadcast %cst_21 : f32 to vector<8x1xf32>
      %c0_22 = arith.constant 0 : index
      %c0_23 = arith.constant 0 : index
      %38 = vector.load %arg5[%c0_22, %c0_23] : memref<8x1xf32, #tpu.memory_space<vmem>>, vector<8x1xf32>
      tpu.vector_store %arg5[%c0_22, %c0_23], %37 {strides = array<i32>} : memref<8x1xf32, #tpu.memory_space<vmem>>, vector<8x1xf32>,
      %cst_24 = arith.constant 0.000000e+00 : f32
      %39 = vector.broadcast %cst_24 : f32 to vector<8x1xf32>
      %c0_25 = arith.constant 0 : index
      %c0_26 = arith.constant 0 : index
      %40 = vector.load %arg6[%c0_25, %c0_26] : memref<8x1xf32, #tpu.memory_space<vmem>>, vector<8x1xf32>
      tpu.vector_store %arg6[%c0_25, %c0_26], %39 {strides = array<i32>} : memref<8x1xf32, #tpu.memory_space<vmem>>, vector<8x1xf32>,
      %cst_27 = arith.constant 0.000000e+00 : f32
      %41 = vector.broadcast %cst_27 : f32 to vector<8x1xf32>
      %c0_28 = arith.constant 0 : index
      %c0_29 = arith.constant 0 : index
      %42 = vector.load %arg7[%c0_28, %c0_29] : memref<8x1xf32, #tpu.memory_space<vmem>>, vector<8x1xf32>
      tpu.vector_store %arg7[%c0_28, %c0_29], %41 {strides = array<i32>} : memref<8x1xf32, #tpu.memory_space<vmem>>, vector<8x1xf32>,
    } else {
    }
    %c0 = arith.constant 0 : index
    %c0_1 = arith.constant 0 : index
    %3 = vector.load %arg3[%c0, %c0_1] : memref<8x32xf32, #tpu.memory_space<vmem>>, vector<8x32xf32>
    %c0_2 = arith.constant 0 : index
    %c0_3 = arith.constant 0 : index
    %4 = vector.load %arg2[%c0_2, %c0_3] : memref<8x1xi32, #tpu.memory_space<vmem>>, vector<8x1xi32>
    %5 = tpu.iota {dimensions = array<i32: 1>} : vector<8x32xi32>
    %cst = arith.constant dense<0xFF800000> : vector<8xf32>
    %6 = vector.multi_reduction <maximumf>, %3, %cst [1] : vector<8x32xf32> to vector<8xf32>
    %7 = vector.shape_cast %6 : vector<8xf32> to vector<8x1xf32>
    %c32_i32 = arith.constant 32 : i32
    %8 = arith.muli %arg1, %c32_i32 : i32
    %9 = vector.broadcast %8 : i32 to vector<8x1xi32>
    %10 = arith.subi %4, %9 : vector<8x1xi32>
    %11 = vector.broadcast %10 : vector<8x1xi32> to vector<8x32xi32>
    %12 = arith.cmpi eq, %5, %11 : vector<8x32xi32>
    %c0_4 = arith.constant 0 : index
    %c0_5 = arith.constant 0 : index
    %13 = vector.load %arg7[%c0_4, %c0_5] : memref<8x1xf32, #tpu.memory_space<vmem>>, vector<8x1xf32>
    %cst_6 = arith.constant 0.000000e+00 : f32
    %14 = vector.broadcast %cst_6 : f32 to vector<8x32xf32>
    %15 = arith.select %12, %3, %14 : vector<8x32xi1>, vector<8x32xf32>
    %cst_7 = arith.constant dense<0.000000e+00> : vector<8xf32>
    %16 = vector.multi_reduction <add>, %15, %cst_7 [1] : vector<8x32xf32> to vector<8xf32>
    %17 = vector.shape_cast %16 : vector<8xf32> to vector<8x1xf32>
    %18 = arith.addf %13, %17 : vector<8x1xf32>
    %c0_8 = arith.constant 0 : index
    %c0_9 = arith.constant 0 : index
    %19 = vector.load %arg7[%c0_8, %c0_9] : memref<8x1xf32, #tpu.memory_space<vmem>>, vector<8x1xf32>
    tpu.vector_store %arg7[%c0_8, %c0_9], %18 {strides = array<i32>} : memref<8x1xf32, #tpu.memory_space<vmem>>, vector<8x1xf32>,
    %c0_10 = arith.constant 0 : index
    %c0_11 = arith.constant 0 : index
    %20 = vector.load %arg5[%c0_10, %c0_11] : memref<8x1xf32, #tpu.memory_space<vmem>>, vector<8x1xf32>
    %21 = arith.maximumf %20, %7 : vector<8x1xf32>
    %c0_12 = arith.constant 0 : index
    %c0_13 = arith.constant 0 : index
    %22 = vector.load %arg6[%c0_12, %c0_13] : memref<8x1xf32, #tpu.memory_space<vmem>>, vector<8x1xf32>
    %23 = arith.subf %20, %21 : vector<8x1xf32>
    %24 = math.exp %23 : vector<8x1xf32>
    %25 = arith.mulf %22, %24 : vector<8x1xf32>
    %26 = vector.broadcast %21 : vector<8x1xf32> to vector<8x32xf32>
    %27 = arith.subf %3, %26 : vector<8x32xf32>
    %28 = math.exp %27 : vector<8x32xf32>
    %cst_14 = arith.constant dense<0.000000e+00> : vector<8xf32>
    %29 = vector.multi_reduction <add>, %28, %cst_14 [1] : vector<8x32xf32> to vector<8xf32>
    %30 = vector.shape_cast %29 : vector<8xf32> to vector<8x1xf32>
    %31 = arith.addf %25, %30 : vector<8x1xf32>
    %c0_15 = arith.constant 0 : index
    %c0_16 = arith.constant 0 : index
    %32 = vector.load %arg6[%c0_15, %c0_16] : memref<8x1xf32, #tpu.memory_space<vmem>>, vector<8x1xf32>
    tpu.vector_store %arg6[%c0_15, %c0_16], %31 {strides = array<i32>} : memref<8x1xf32, #tpu.memory_space<vmem>>, vector<8x1xf32>,
    %c0_17 = arith.constant 0 : index
    %c0_18 = arith.constant 0 : index
    %33 = vector.load %arg5[%c0_17, %c0_18] : memref<8x1xf32, #tpu.memory_space<vmem>>, vector<8x1xf32>
    tpu.vector_store %arg5[%c0_17, %c0_18], %21 {strides = array<i32>} : memref<8x1xf32, #tpu.memory_space<vmem>>, vector<8x1xf32>,
    %c0_i32_19 = arith.constant 0 : i32
    %34 = arith.cmpi eq, %arg1, %c0_i32_19 : i32
    %35 = arith.extui %34 : i1 to i32
    %c0_i32_20 = arith.constant 0 : i32
    %36 = arith.cmpi ne, %35, %c0_i32_20 : i32
    scf.if %36 {
      %c0_21 = arith.constant 0 : index
      %c0_22 = arith.constant 0 : index
      %37 = vector.load %arg5[%c0_21, %c0_22] : memref<8x1xf32, #tpu.memory_space<vmem>>, vector<8x1xf32>
      %c0_23 = arith.constant 0 : index
      %c0_24 = arith.constant 0 : index
      %38 = vector.load %arg6[%c0_23, %c0_24] : memref<8x1xf32, #tpu.memory_space<vmem>>, vector<8x1xf32>
      %39 = math.log %38 : vector<8x1xf32>
      %40 = arith.addf %37, %39 : vector<8x1xf32>
      %c0_25 = arith.constant 0 : index
      %c0_26 = arith.constant 0 : index
      %41 = vector.load %arg7[%c0_25, %c0_26] : memref<8x1xf32, #tpu.memory_space<vmem>>, vector<8x1xf32>
      %42 = arith.subf %40, %41 : vector<8x1xf32>
      %cst_27 = arith.constant 0.000000e+00 : f32
      %43 = vector.broadcast %cst_27 : f32 to vector<8x1xf32>
      %44 = arith.subf %43, %42 : vector<8x1xf32>
      %45 = math.exp %44 : vector<8x1xf32>
      %46 = math.exp %45 : vector<8x1xf32>
      %cst_28 = arith.constant 0.000000e+00 : f32
      %47 = vector.broadcast %cst_28 : f32 to vector<8x1xf32>
      %48 = arith.subf %47, %46 : vector<8x1xf32>
      %cst_29 = arith.constant 5.000000e-01 : f32
      %49 = vector.broadcast %cst_29 : f32 to vector<8x1xf32>
      %50 = arith.mulf %49, %42 : vector<8x1xf32>
      %cst_30 = arith.constant 5.000000e-01 : f32
      %51 = vector.broadcast %cst_30 : f32 to vector<8x1xf32>
      %52 = arith.mulf %51, %48 : vector<8x1xf32>
      %53 = arith.addf %50, %52 : vector<8x1xf32>
      %c0_31 = arith.constant 0 : index
      %c0_32 = arith.constant 0 : index
      %54 = vector.load %arg4[%c0_31, %c0_32] : memref<8x1xf32, #tpu.memory_space<vmem>>, vector<8x1xf32>
      tpu.vector_store %arg4[%c0_31, %c0_32], %53 {strides = array<i32>} : memref<8x1xf32, #tpu.memory_space<vmem>>, vector<8x1xf32>,
    } else {
    }
    return
  }
  func.func @transform_0(%arg0: i32, %arg1: i32) -> (i32, i32) {
    %c0_i32 = arith.constant 0 : i32
    %c0_i32_0 = arith.constant 0 : i32
    return %arg0, %c0_i32 : i32, i32
  }
  func.func @transform_1(%arg0: i32, %arg1: i32) -> (i32, i32) {
    %c0_i32 = arith.constant 0 : i32
    return %arg0, %arg1 : i32, i32
  }
  func.func @transform_2(%arg0: i32, %arg1: i32) -> (i32, i32) {
    %c0_i32 = arith.constant 0 : i32
    %c0_i32_0 = arith.constant 0 : i32
    return %arg0, %c0_i32 : i32, i32
  }
}

</mosaic_0001>

<bundles_post_ra>
// kernel: tpu_custom_call.1
= control target key start
LH: loop header
LB: loop body
LE: loop exit
PB: predicated region body
PF: predicated region fallthrough
CT: control target
= control target key end

     0   :  { %vm23_vm0 = vcmask 261120   ;;  %vm15_vm1 = vcmask 7168   ;;  %v102_v1 = vmov -inf   ;;  %v103_v3 = vmov 0   ;;  %s139_s1 = inlined_call_operand.vmem [shape: f32[8,32], index: 1, kind: input, shape index: {}]   ;;  %s140_s0 = inlined_call_operand.vmem [shape: s32[8,1], index: 0, kind: input, shape index: {}]   ;;  %s141_s2 = inlined_call_operand.vmem [shape: f32[8,1], index: 2, kind: output, shape index: {}]  }
   0x1   :  { %v19_v0 = vld [vmem:[%s139_s1] sm:$0xff]  ;;  %16 = vst.msk [vmem:[#allocation2] sm:$0xff] %vm15_vm1, %v102_v1  ;;  %90 = vset.pattern.permute.xlu0 %v103_v3  ;;  %91 = vset.pattern.permute.xlu1 %v103_v3  ;;  %v104_v4 = vmov 0.0   ;;  %v21_v13 = vlaneseq }
   0x2   :  { %v24_v2 = vsel %vm23_vm0, %v19_v0, -inf  ;;  %17 = vst.msk [vmem:[#allocation3] sm:$0xff] %vm15_vm1, %v104_v4  ;;  %18 = vst.msk [vmem:[#allocation4] sm:$0xff] %vm15_vm1, %v104_v4  ;;  %v20_v5 = vld [vmem:[%s140_s0] sm:$0xff] }
   0x3   :  { %25 = vmax.xlane.f32.xlu0 %v24_v2  ;;  %31 = vperm.xlu1 %91, %v20_v5   ;;  %v22_v14 = vand.u32 127, %v21_v13 }
   0x8   :  { %v42_v6 = vld [vmem:[#allocation2] sm:$0xff] }
   0x9   :  { %v44_v22 = vld [vmem:[#allocation3] sm:$0xff]  ;;  %v34_v26 = vld [vmem:[#allocation4] sm:$0xff] }
  0x82   :  { %v32_v15 = vpop.permute.xlu1 %31 }
  0x83   :  { %vm33_vm2 = vcmp.eq.s32.totalorder %v22_v14, %v32_v15 }
  0x84   :  { %v35_v17 = vsel %vm33_vm2, %v19_v0, 0.0 }
  0x85   :  { %v36_v19 = vsel %vm23_vm0, %v35_v17, 0.0 }
  0x90   :  { %v26_v7 = vpop.xlane.xlu0 %25 }
  0x91   :  { %v43_v8 = vmax.f32 %v42_v6, %v26_v7 }
  0x93   :  { %v45_v9 = vsub.f32 %v42_v6, %v43_v8  ;;  %62 = vst.msk [vmem:[#allocation2] sm:$0xff] %vm15_vm1, %v43_v8  ;;  %51 = vperm.xlu0 %90, %v43_v8  }
  0x95   :  { %v46_v20 = vmul.f32 1.442695, %v45_v9 }
  0x9a   :  { %v66_v32 = vld [vmem:[#allocation2] sm:$0xff] }
 0x112   :  { %v52_v10 = vpop.permute.xlu0 %51 }
 0x113   :  { %v54_v11 = vsub.f32 %v19_v0, %v52_v10 }
 0x115   :  { %v55_v12 = vmul.f32 1.442695, %v54_v11 }
 0x117   :  { %92 = vpow2.f32 %v55_v12 }
 0x118   :  { %94 = vpow2.f32 %v46_v20 }
 0x121   :  { %v93_v16 = vpop.eup %92 }
 0x122   :  { %v57_v18 = vsel %vm23_vm0, %v93_v16, 0.0  ;;  %v95_v21 = vpop.eup %94 }
 0x123   :  { %58 = vadd.xlane.f32.xlu1 %v57_v18  ;;  %v48_v23 = vmul.f32 %v95_v21, %v44_v22 }
 0x127   :  { %37 = vadd.xlane.f32.xlu1 %v36_v19 }
 0x1b0   :  { %v59_v24 = vpop.xlane.xlu1 %58 }
 0x1b1   :  { %v60_v25 = vadd.f32 %v59_v24, %v48_v23 }
 0x1b3   :  { %61 = vst.msk [vmem:[#allocation3] sm:$0xff] %vm15_vm1, %v60_v25 }
 0x1b4   :  { %v38_v27 = vpop.xlane.xlu1 %37 }
 0x1b5   :  { %v39_v28 = vadd.f32 %v38_v27, %v34_v26 }
 0x1b7   :  { %41 = vst.msk [vmem:[#allocation4] sm:$0xff] %vm15_vm1, %v39_v28 }
 0x1ba   :  { %v67_v29 = vld [vmem:[#allocation3] sm:$0xff] }
 0x1bb   :  { %96 = vlog2.f32 %v67_v29 }
 0x1be   :  { %v71_v33 = vld [vmem:[#allocation4] sm:$0xff] }
 0x1c5   :  { %v97_v30 = vpop.eup %96 }
 0x1c6   :  { %v69_v31 = vmul.f32 0.6931472, %v97_v30 }
 0x1c8   :  { %v70_v34 = vadd.f32 %v69_v31, %v66_v32 }
 0x1ca   :  { %v72_v35 = vsub.f32 %v70_v34, %v71_v33 }
 0x1cc   :  { %v73_v36 = vsub.f32 0.0, %v72_v35  ;;  %v79_v42 = vmul.f32 0.5, %v72_v35 }
 0x1ce   :  { %v74_v37 = vmul.f32 1.442695, %v73_v36 }
 0x1d0   :  { %98 = vpow2.f32 %v74_v37 }
 0x1da   :  { %v99_v38 = vpop.eup %98 }
 0x1db   :  { %v76_v39 = vmul.f32 1.442695, %v99_v38 }
 0x1dd   :  { %100 = vpow2.f32 %v76_v39 }
 0x1e7   :  { %v101_v40 = vpop.eup %100 }
 0x1e8   :  { %v78_v41 = vsub.f32 0.0, %v101_v40 }
 0x1ea   :  { %v80_v43 = vmul.f32 0.5, %v78_v41 }
 0x1ec   :  { %v81_v44 = vadd.f32 %v80_v43, %v79_v42 }
 0x1ee   :  { %82 = vst.msk [vmem:[%s141_s2] sm:$0xff] %vm15_vm1, %v81_v44 }

</bundles_post_ra>
